<compile_context>
chip_gen: v7x
topology: tpu7x:2x2x1
jax: 0.10.0
libtpu: 0.0.40
codegen_flags: <defaults>
</compile_context>

<pallas_src>
import jax
import jax.numpy as jnp
from jax.experimental import pallas as pl
from jax.experimental.pallas import tpu as pltpu


def _output_norm_kernel(x_ref, o_ref):
    # x_ref / o_ref: (tile_b, C) tile in VMEM.
    x = x_ref[...]
    col = jax.lax.broadcasted_iota(jnp.int32, x.shape, 1)
    big = jnp.int32(2 ** 30)

    # Row-wise max over the class (lane) dimension.
    row_max = jnp.max(x, axis=1, keepdims=True)
    # First occurrence of the max (torch.argmax tie-break: smallest index).
    argmax_idx = jnp.min(jnp.where(x == row_max, col, big), axis=1, keepdims=True)

    if jnp.issubdtype(x.dtype, jnp.floating):
        # torch.argmax treats NaN as greater than everything: if a row holds a
        # NaN, row_max is NaN, the equality mask above is all-False and the
        # sentinel survives -- fall back to the first NaN's index.
        nan_idx = jnp.min(jnp.where(jnp.isnan(x), col, big), axis=1, keepdims=True)
        argmax_idx = jnp.where(argmax_idx == big, nan_idx, argmax_idx)

    # One-hot encode along classes, cast to the output dtype.
    o_ref[...] = (col == argmax_idx).astype(o_ref.dtype)


def _sublane_min(dtype) -> int:
    """Native sublane count per vreg for this dtype (f32:8, bf16:16, 8-bit:32)."""
    bits = jnp.dtype(dtype).itemsize * 8
    if bits >= 32:
        return 8
    if bits == 16:
        return 16
    return 32


def _pick_tile_b(B: int, C_pad: int, itemsize: int, sublane: int,
                 vmem_budget_bytes: int) -> int:
    # Per block row we hold: input tile + output tile, each double-buffered.
    per_row_bytes = C_pad * itemsize * 2 * 2
    tile_b = (vmem_budget_bytes // max(per_row_bytes, 1)) // sublane * sublane
    tile_b = max(tile_b, sublane)
    tile_b = min(tile_b, 2048)                            # diminishing returns past ~2K rows
    tile_b = min(tile_b, pl.cdiv(B, sublane) * sublane)   # single block when B is small
    return max(tile_b, sublane)


def output_normalization(x, *, tile_b=None, vmem_budget_bytes=16 * 1024 * 1024):
    """Pallas implementation of OutputNormalization.forward for (B, C) inputs."""
    B, C = x.shape
    dtype = x.dtype
    itemsize = jnp.dtype(dtype).itemsize
    sublane = _sublane_min(dtype)

    # VMEM tiles are internally lane-padded to a multiple of 128; budget for it.
    C_pad = pl.cdiv(C, 128) * 128

    if tile_b is None:
        tile_b = _pick_tile_b(B, C_pad, itemsize, sublane, vmem_budget_bytes)
    else:
        tile_b = max(sublane, (tile_b // sublane) * sublane)

    grid = (pl.cdiv(B, tile_b),)

    return pl.pallas_call(
        _output_norm_kernel,
        out_shape=jax.ShapeDtypeStruct((B, C), dtype),
        grid=grid,
        # Last block dim equals the full array dim C, so no padding of the
        # input is required even when C % 128 != 0.
        in_specs=[pl.BlockSpec((tile_b, C), lambda i: (i, 0))],
        out_specs=pl.BlockSpec((tile_b, C), lambda i: (i, 0)),
        compiler_params=pltpu.CompilerParams(
            dimension_semantics=("parallel",),
            vmem_limit_bytes=32 * 1024 * 1024,
        ),
    )(x)


def _reference(x):
    # Pure-JAX reference mirroring the PyTorch module.
    idx = jnp.argmax(x, axis=1)
    return jax.nn.one_hot(idx, x.shape[1], dtype=x.dtype)


if __name__ == "__main__":
    key = jax.random.PRNGKey(0)

    # Case 1: small classifier-style output, lane-aligned class dim.
    B, C = 8, 128
    x = jax.random.normal(key, (B, C), dtype=jnp.float32)
    out = jax.block_until_ready(output_normalization(x))
    ref = _reference(x)
    assert out.shape == x.shape and out.dtype == x.dtype
    assert bool(jnp.all(out == ref))

    # Case 2: awkward shape -- exercises cdiv row grid + non-128 class dim
    # (no wrapper-side padding / slicing needed anymore).
    B2, C2 = 37, 10
    x2 = jax.random.normal(jax.random.PRNGKey(0), (B2, C2), dtype=jnp.float32)
    out2 = jax.block_until_ready(output_normalization(x2))
    ref2 = _reference(x2)
    assert out2.shape == x2.shape and out2.dtype == x2.dtype
    assert bool(jnp.all(out2 == ref2))

    # Case 3: bf16 dtype, class dim just past a lane boundary.
    B3, C3 = 16, 130
    x3 = jax.random.normal(jax.random.PRNGKey(0), (B3, C3), dtype=jnp.bfloat16)
    out3 = jax.block_until_ready(output_normalization(x3))
    ref3 = _reference(x3)
    assert out3.shape == x3.shape and out3.dtype == x3.dtype
    assert bool(jnp.all(out3 == ref3))

    print("KERNEL_OK")
</pallas_src>

<mosaic_0001>
module attributes {stable_mosaic.version = 11 : i64} {
  func.func @_output_norm_kernel(%arg0: i32, %arg1: memref<8x128xf32, #tpu.memory_space<vmem>>, %arg2: memref<8x128xf32, #tpu.memory_space<vmem>>) attributes {dimension_semantics = [#tpu.dimension_semantics<parallel>], iteration_bounds = array<i64: 1>, scalar_prefetch = 0 : i64, scratch_operands = 0 : i64, tpu.core_type = #tpu.core_type<tc>, window_params = [{transform_indices = @transform_0, window_bounds = array<i64: 8, 128>}, {transform_indices = @transform_1, window_bounds = array<i64: 8, 128>}]} {
    %c0 = arith.constant 0 : index
    %c0_0 = arith.constant 0 : index
    %0 = vector.load %arg1[%c0, %c0_0] : memref<8x128xf32, #tpu.memory_space<vmem>>, vector<8x128xf32>
    %1 = tpu.iota {dimensions = array<i32: 1>} : vector<8x128xi32>
    %cst = arith.constant dense<0xFF800000> : vector<8xf32>
    %2 = vector.multi_reduction <maximumf>, %0, %cst [1] : vector<8x128xf32> to vector<8xf32>
    %3 = vector.shape_cast %2 : vector<8xf32> to vector<8x1xf32>
    %4 = vector.broadcast %3 : vector<8x1xf32> to vector<8x128xf32>
    %5 = arith.cmpf oeq, %0, %4 : vector<8x128xf32>
    %c1073741824_i32 = arith.constant 1073741824 : i32
    %6 = vector.broadcast %c1073741824_i32 : i32 to vector<8x128xi32>
    %7 = arith.select %5, %1, %6 : vector<8x128xi1>, vector<8x128xi32>
    %cst_1 = arith.constant dense<2147483647> : vector<8xi32>
    %8 = vector.multi_reduction <minsi>, %7, %cst_1 [1] : vector<8x128xi32> to vector<8xi32>
    %9 = vector.shape_cast %8 : vector<8xi32> to vector<8x1xi32>
    %10 = arith.cmpf one, %0, %0 : vector<8x128xf32>
    %c1073741824_i32_2 = arith.constant 1073741824 : i32
    %11 = vector.broadcast %c1073741824_i32_2 : i32 to vector<8x128xi32>
    %12 = arith.select %10, %1, %11 : vector<8x128xi1>, vector<8x128xi32>
    %cst_3 = arith.constant dense<2147483647> : vector<8xi32>
    %13 = vector.multi_reduction <minsi>, %12, %cst_3 [1] : vector<8x128xi32> to vector<8xi32>
    %14 = vector.shape_cast %13 : vector<8xi32> to vector<8x1xi32>
    %c1073741824_i32_4 = arith.constant 1073741824 : i32
    %15 = vector.broadcast %c1073741824_i32_4 : i32 to vector<8x1xi32>
    %16 = arith.cmpi eq, %9, %15 : vector<8x1xi32>
    %17 = arith.select %16, %14, %9 : vector<8x1xi1>, vector<8x1xi32>
    %18 = vector.broadcast %17 : vector<8x1xi32> to vector<8x128xi32>
    %19 = arith.cmpi eq, %1, %18 : vector<8x128xi32>
    %20 = arith.extui %19 : vector<8x128xi1> to vector<8x128xi32>
    %21 = arith.sitofp %20 : vector<8x128xi32> to vector<8x128xf32>
    %c0_5 = arith.constant 0 : index
    %c0_6 = arith.constant 0 : index
    %22 = vector.load %arg2[%c0_5, %c0_6] : memref<8x128xf32, #tpu.memory_space<vmem>>, vector<8x128xf32>
    tpu.vector_store %arg2[%c0_5, %c0_6], %21 {strides = array<i32>} : memref<8x128xf32, #tpu.memory_space<vmem>>, vector<8x128xf32>,
    return
  }
  func.func @transform_0(%arg0: i32) -> (i32, i32) {
    %c0_i32 = arith.constant 0 : i32
    %c0_i32_0 = arith.constant 0 : i32
    return %arg0, %c0_i32 : i32, i32
  }
  func.func @transform_1(%arg0: i32) -> (i32, i32) {
    %c0_i32 = arith.constant 0 : i32
    %c0_i32_0 = arith.constant 0 : i32
    return %arg0, %c0_i32 : i32, i32
  }
}

</mosaic_0001>

<bundles_post_ra>
// kernel: tpu_custom_call.1
= control target key start
LH: loop header
LB: loop body
LE: loop exit
PB: predicated region body
PF: predicated region fallthrough
CT: control target
= control target key end

     0   :  { %6 = vsyncpa [#allocation3], 0  ;;  %s168_s0 = inlined_call_operand.hbm [shape: f32[8,128], index: 0, kind: input, shape index: {}]   ;;  %s169_s1 = inlined_call_operand.hbm [shape: f32[8,128], index: 1, kind: output, shape index: {}]  }
   0x1   :  { %7 = vsyncpa [#allocation4], 0  ;;  %s131_s6 = smov [#allocation2]   ;;  %s83_s10 = scalar_lea.hbm %s168_s0, 128 }
   0x2   :  { %s14_s7 = sshll.u32 %s131_s6, 4  ;;  %p84_p0 = scmp.ne.s32.totalorder %s168_s0, %s83_s10  ;;  %s15_s7 = int_to_ptr.vmem [resolvable:$true] %s14_s7 }
   0x3   :  { %p87_p1 = scmp.lt.u32.totalorder %s83_s10, %s168_s0 }
   0x5   :  { %p89_p2 = pnand %p87_p1, %p84_p0 }
   0x7   :  { %92 = shalt.err (!%p89_p2)
}
   0x8   :  { %s93_s15 = scalar_lea.vmem %s15_s7, 128  ;;  %p98_p4 = scmp.lt.s32.totalorder %s15_s7, %s15_s7 }
   0x9   :  { %p94_p3 = scmp.ne.s32.totalorder %s15_s7, %s93_s15  ;;  %p99_p5 = scmp.lt.s32.totalorder %s93_s15, %s93_s15 }
   0xb   :  { %p100_p6 = por %p99_p5, %p98_p4 }
   0xd   :  { %p101_p7 = pnand %p100_p6, %p94_p3 }
   0xf   :  { %104 = shalt.err (!%p101_p7)
}
  0x10   :  { %17 = dma.hbm_to_vmem [thread:$0]  %s168_s0, 128, %s15_s7, [#allocation3]  }
  0x11   :  { %127 = dma.done.wait [#allocation3], 128  }
  0x12   :  { %128 = vsyncadd [#allocation3], 4294967168  ;;  %v22_v0 = vlaneseq  ;;  %v21_v2 = vld [vmem:[#allocation2] sm:$0xff]  ;;  %s132_s0 = smov [#allocation5]   ;;  %v133_v29 = vmov 0.0  }
  0x13   :  { %24 = vmax.xlane.f32.xlu0 %v21_v2  ;;  %vm42_vm0 = vcmp.ne.f32.partialorder %v21_v2, %v21_v2  ;;  %s70_s18 = sshll.u32 %s132_s0, 4  ;;  %s71_s18 = int_to_ptr.vmem [resolvable:$true] %s70_s18 }
  0x14   :  { %v23_v1 = vand.u32 127, %v22_v0  ;;  %s105_s19 = scalar_lea.vmem %s71_s18, 128  ;;  %p110_p9 = scmp.lt.s32.totalorder %s71_s18, %s71_s18 }
  0x15   :  { %p106_p8 = scmp.ne.s32.totalorder %s71_s18, %s105_s19  ;;  %p111_p10 = scmp.lt.s32.totalorder %s105_s19, %s105_s19 }
  0x16   :  { %v43_v3 = vsel %vm42_vm0, %v23_v1, 1073741824 }
  0x17   :  { %v45_v4 = vshra.s32 %v43_v3, 16  ;;  %v44_v7 = vand.u32 65535, %v43_v3  ;;  %p112_p11 = por %p111_p10, %p110_p9 }
  0x19   :  { %v47_v5 = vcvt.s32.f32 %v45_v4  ;;  %v46_v10 = vcvt.s32.f32 %v44_v7  ;;  %p113_p12 = pnand %p112_p11, %p106_p8 }
  0x1b   :  { %48 = vmin.xlane.f32.xlu1 %v47_v5 }
  0xa0   :  { %v25_v6 = vpop.xlane.xlu0 %24 }
  0xa1   :  { %vm26_vm1 = vcmp.eq.f32.partialorder %v21_v2, %v25_v6 }
  0xa2   :  { %v27_v8 = vsel %vm26_vm1, %v23_v1, 1073741824 }
  0xa3   :  { %v29_v9 = vshra.s32 %v27_v8, 16  ;;  %v28_v14 = vand.u32 65535, %v27_v8 }
  0xa5   :  { %v31_v11 = vcvt.s32.f32 %v29_v9  ;;  %v30_v16 = vcvt.s32.f32 %v28_v14 }
  0xa7   :  { %32 = vmin.xlane.f32.xlu0 %v31_v11 }
  0xa8   :  { %v49_v12 = vpop.xlane.xlu1 %48 }
  0xa9   :  { %vm50_vm2 = vcmp.eq.f32.partialorder %v47_v5, %v49_v12  ;;  %v55_v18 = vcvt.f32.s32 %v49_v12 }
  0xaa   :  { %v51_v13 = vsel %vm50_vm2, %v46_v10, inf }
  0xab   :  { %52 = vmin.xlane.f32.xlu0 %v51_v13  ;;  %v56_v21 = vshll.u32 %v55_v18, 16 }
 0x134   :  { %v33_v15 = vpop.xlane.xlu0 %32 }
 0x135   :  { %vm34_vm3 = vcmp.eq.f32.partialorder %v31_v11, %v33_v15  ;;  %v39_v19 = vcvt.f32.s32 %v33_v15 }
 0x136   :  { %v35_v17 = vsel %vm34_vm3, %v30_v16, inf }
 0x137   :  { %36 = vmin.xlane.f32.xlu1 %v35_v17  ;;  %v40_v24 = vshll.u32 %v39_v19, 16 }
 0x138   :  { %v53_v20 = vpop.xlane.xlu0 %52 }
 0x139   :  { %v54_v22 = vcvt.f32.s32 %v53_v20 }
 0x13b   :  { %v57_v27 = vadd.s32 %v56_v21, %v54_v22 }
 0x1c4   :  { %v37_v23 = vpop.xlane.xlu1 %36 }
 0x1c5   :  { %v38_v25 = vcvt.f32.s32 %v37_v23 }
 0x1c7   :  { %v41_v26 = vadd.s32 %v40_v24, %v38_v25 }
 0x1c9   :  { %vm58_vm4 = vcmp.eq.s32.totalorder %v41_v26, 1073741824 }
 0x1ca   :  { %v59_v28 = vsel %vm58_vm4, %v57_v27, %v41_v26 }
 0x1cb   :  { %vm60_vm5 = vcmp.eq.s32.totalorder %v23_v1, %v59_v28 }
 0x1cc   :  { %v79_v30 = vsel %vm60_vm5, 1.0, %v133_v29 }
 0x1cd   :  { %63 = vst [vmem:[#allocation5] sm:$0xff] %v79_v30 }
 0x1ce   :  { %116 = shalt.err (!%p113_p12)
}
 0x1cf   :  { %s117_s22 = scalar_lea.hbm %s169_s1, 128 }
 0x1d0   :  { %p118_p13 = scmp.ne.s32.totalorder %s169_s1, %s117_s22  ;;  %p121_p0 = scmp.lt.u32.totalorder %s117_s22, %s169_s1 }
 0x1d2   :  { %p123_p1 = pnand %p121_p0, %p118_p13 }
 0x1d4   :  { %126 = shalt.err (!%p123_p1)
}
 0x1d5   :  { %73 = dma.vmem_to_hbm [thread:$0]  %s71_s18, 128, %s169_s1, [#allocation4]  }
 0x1d6   :  { %129 = dma.done.wait [#allocation4], 128  }
 0x1d7   :  { %130 = vsyncadd [#allocation4], 4294967168 }
 0x1d8   :  { %77 = vsyncpa [#allocation3], 1 }
 0x1d9   :  { %78 = vsyncpa [#allocation4], 1 }

</bundles_post_ra>
